<compile_context>
chip_gen: v7x
topology: tpu7x:2x2x1
jax: 0.10.0
libtpu: 0.0.40
codegen_flags: <defaults>
</compile_context>

<pallas_src>
from functools import partial

import jax
import jax.numpy as jnp
from jax.experimental import pallas as pl
from jax.experimental.pallas import tpu as pltpu


def _round_up(n, m):
    return ((n + m - 1) // m) * m


def _mlp_kernel(p_ref, x_ref, o_ref):
    # p_ref: [32, 128] packed parameter slab (resident across all grid steps)
    # x_ref: [3, TB]   feature-major activation tile (batch on the lane axis)
    # o_ref: [1, TB]   lane-dense output tile
    p = p_ref[...]
    x = x_ref[...]

    w1t, b1 = p[0:8, 0:3], p[0:8, 3:4]        # [8, 3],  [8, 1]
    w2t, b2 = p[8:24, 0:8], p[8:24, 8:9]      # [16, 8], [16, 1]
    w3c = p[8:24, 9:10]                        # [16, 1]  (w3 as a column)
    b3 = p[24:25, 0:1]                         # [1, 1]

    # Layer 1: MXU dot, f32 accumulation, bias + ReLU on the VPU.
    h1 = jnp.dot(w1t, x, preferred_element_type=jnp.float32) + b1   # [8, TB]
    h1 = jnp.maximum(h1, 0.0)
    # dropOut1: identity in eval mode.

    # Layer 2: MXU dot.
    h2 = jnp.dot(w2t, h1, preferred_element_type=jnp.float32) + b2  # [16, TB]
    h2 = jnp.maximum(h2, 0.0)
    # dropOut2: identity in eval mode.

    # Layer 3 (16 -> 1): elementwise multiply + cross-sublane (XLU) reduce.
    logits = jnp.sum(h2 * w3c, axis=0, keepdims=True) + b3          # [1, TB]

    # Sigmoid via a single EUP tanh (exact, one transcendental).
    o_ref[...] = 0.5 * (1.0 + jnp.tanh(0.5 * logits))


def _pack_params(params):
    """Pack w1,b1,w2,b2,w3,b3 into a single lane-aligned [32, 128] f32 slab."""
    w1, b1 = params["w1"], params["b1"]   # [3, 8],  [1, 8]
    w2, b2 = params["w2"], params["b2"]   # [8, 16], [1, 16]
    w3, b3 = params["w3"], params["b3"]   # [16, 1], [1, 1]

    slab = jnp.zeros((32, 128), jnp.float32)
    slab = slab.at[0:8, 0:3].set(w1.T)        # W1^T
    slab = slab.at[0:8, 3:4].set(b1.T)        # b1 as a column
    slab = slab.at[8:24, 0:8].set(w2.T)       # W2^T
    slab = slab.at[8:24, 8:9].set(b2.T)       # b2 as a column
    slab = slab.at[8:24, 9:10].set(w3)        # w3 column ([16, 1])
    slab = slab.at[24:25, 0:1].set(b3)        # b3 scalar
    return slab


def _tiling(B, tile_b):
    """Balanced tiling: per-tile zero padding <128 lanes, >=2 steps when possible."""
    b128 = _round_up(B, 128)                  # lane-aligned batch
    n = pl.cdiv(b128, tile_b)                 # steps needed at the target tile
    if b128 >= 256:
        n = max(n, 2)                         # >=2 grid steps -> both v7x TCs busy
    tb = _round_up(pl.cdiv(b128, n), 128)     # balanced, lane-aligned tile
    b_pad = n * tb
    return n, tb, b_pad


@partial(jax.jit, static_argnames=("tile_b",))
def simple_model_forward(x, params, *, tile_b=32768):
    """x: [B, 3] float32.  params: dict of w1,b1,w2,b2,w3,b3 (see init_params)."""
    B = x.shape[0]
    slab = _pack_params(params)                       # [32, 128], resident

    n, tb, b_pad = _tiling(B, tile_b)

    # Lane-dense, batch-tiled layout: [3, b_pad]. Fused with the kernel under jit.
    x_t = jnp.zeros((3, b_pad), jnp.float32).at[:, :B].set(x.T)

    out_t = pl.pallas_call(
        _mlp_kernel,
        out_shape=jax.ShapeDtypeStruct((1, b_pad), jnp.float32),
        grid=(n,),
        in_specs=[
            pl.BlockSpec((32, 128), lambda i: (0, 0)),  # params: resident
            pl.BlockSpec((3, tb), lambda i: (0, i)),    # x: batch-tiled
        ],
        out_specs=pl.BlockSpec((1, tb), lambda i: (0, i)),
        compiler_params=pltpu.CompilerParams(
            dimension_semantics=("parallel",)),          # shards across 2 TCs on v7x
    )(slab, x_t)                                         # [1, b_pad]

    return out_t[:, :B].T                                # [B, 1]


def init_params(key):
    """Deterministic init mimicking nn.Linear's U(-1/sqrt(fan_in), 1/sqrt(fan_in))."""
    ks = jax.random.split(key, 6)

    def linear(kw, kb, fan_in, fan_out):
        bound = 1.0 / jnp.sqrt(fan_in)
        w = jax.random.uniform(kw, (fan_in, fan_out), jnp.float32, -bound, bound)
        b = jax.random.uniform(kb, (1, fan_out), jnp.float32, -bound, bound)
        return w, b

    w1, b1 = linear(ks[0], ks[1], 3, 8)
    w2, b2 = linear(ks[2], ks[3], 8, 16)
    w3, b3 = linear(ks[4], ks[5], 16, 1)
    return dict(w1=w1, b1=b1, w2=w2, b2=b2, w3=w3, b3=b3)


if __name__ == "__main__":
    key = jax.random.PRNGKey(0)
    k_param, k_x = jax.random.split(key)
    params = init_params(k_param)

    # Pure-JAX reference (batch-major, exactly the PyTorch math in eval mode).
    def ref(x, p):
        h1 = jnp.maximum(x @ p["w1"] + p["b1"], 0.0)
        h2 = jnp.maximum(h1 @ p["w2"] + p["b2"], 0.0)
        return jax.nn.sigmoid(h2 @ p["w3"] + p["b3"])

    # Small batch (single 128-lane tile, batch padded up to 128 lanes).
    B = 8
    x = jax.random.normal(k_x, (B, 3), dtype=jnp.float32)
    out = jax.block_until_ready(simple_model_forward(x, params))
    assert out.shape == (B, 1), out.shape
    assert bool(jnp.all((out >= 0.0) & (out <= 1.0))), "sigmoid output out of range"
    assert jnp.allclose(out, ref(x, params), atol=1e-4), "mismatch vs reference (B=8)"

    # Non-multiple-of-128 batch (exercises padding, balanced 2-step grid, slice-back).
    B2 = 200
    x2 = jax.random.normal(jax.random.PRNGKey(1), (B2, 3), dtype=jnp.float32)
    out2 = jax.block_until_ready(simple_model_forward(x2, params))
    assert out2.shape == (B2, 1), out2.shape
    assert jnp.allclose(out2, ref(x2, params), atol=1e-4), "mismatch vs reference (B=200)"

    print("KERNEL_OK")
</pallas_src>

<mosaic_0001>
module attributes {stable_mosaic.version = 11 : i64} {
  func.func @_mlp_kernel(%arg0: i32, %arg1: memref<32x128xf32, #tpu.memory_space<vmem>>, %arg2: memref<3x128xf32, #tpu.memory_space<vmem>>, %arg3: memref<1x128xf32, #tpu.memory_space<vmem>>) attributes {dimension_semantics = [#tpu.dimension_semantics<parallel>], iteration_bounds = array<i64: 1>, scalar_prefetch = 0 : i64, scratch_operands = 0 : i64, tpu.core_type = #tpu.core_type<tc>, window_params = [{pipeline_mode = #tpu.pipeline_mode<synchronous>, transform_indices = @transform_0, window_bounds = array<i64: 32, 128>}, {transform_indices = @transform_1, window_bounds = array<i64: 3, 128>}, {transform_indices = @transform_2, window_bounds = array<i64: 1, 128>}]} {
    %c0 = arith.constant 0 : index
    %c0_0 = arith.constant 0 : index
    %0 = vector.load %arg1[%c0, %c0_0] : memref<32x128xf32, #tpu.memory_space<vmem>>, vector<32x128xf32>
    %c0_1 = arith.constant 0 : index
    %c0_2 = arith.constant 0 : index
    %1 = vector.load %arg2[%c0_1, %c0_2] : memref<3x128xf32, #tpu.memory_space<vmem>>, vector<3x128xf32>
    %2 = vector.extract_strided_slice %0 {offsets = [0, 0], sizes = [8, 3], strides = [1, 1]} : vector<32x128xf32> to vector<8x3xf32>
    %3 = vector.extract_strided_slice %0 {offsets = [0, 3], sizes = [8, 1], strides = [1, 1]} : vector<32x128xf32> to vector<8x1xf32>
    %4 = vector.extract_strided_slice %0 {offsets = [8, 0], sizes = [16, 8], strides = [1, 1]} : vector<32x128xf32> to vector<16x8xf32>
    %5 = vector.extract_strided_slice %0 {offsets = [8, 8], sizes = [16, 1], strides = [1, 1]} : vector<32x128xf32> to vector<16x1xf32>
    %6 = vector.extract_strided_slice %0 {offsets = [8, 9], sizes = [16, 1], strides = [1, 1]} : vector<32x128xf32> to vector<16x1xf32>
    %7 = vector.extract_strided_slice %0 {offsets = [24, 0], sizes = [1, 1], strides = [1, 1]} : vector<32x128xf32> to vector<1x1xf32>
    %cst = arith.constant dense<0.000000e+00> : vector<8x128xf32>
    %8 = tpu.matmul %2, %1, %cst {dimension_numbers = #tpu.dot_dimension_numbers<[1], [0], [0], [1], [0, 0, 1, 1], [], []>} : vector<8x3xf32>, vector<3x128xf32>, vector<8x128xf32> -> vector<8x128xf32>
    %9 = vector.broadcast %3 : vector<8x1xf32> to vector<8x128xf32>
    %10 = arith.addf %8, %9 : vector<8x128xf32>
    %cst_3 = arith.constant 0.000000e+00 : f32
    %11 = vector.broadcast %cst_3 : f32 to vector<8x128xf32>
    %12 = arith.maximumf %10, %11 : vector<8x128xf32>
    %cst_4 = arith.constant dense<0.000000e+00> : vector<16x128xf32>
    %13 = tpu.matmul %4, %12, %cst_4 {dimension_numbers = #tpu.dot_dimension_numbers<[1], [0], [0], [1], [0, 0, 1, 1], [], []>} : vector<16x8xf32>, vector<8x128xf32>, vector<16x128xf32> -> vector<16x128xf32>
    %14 = vector.broadcast %5 : vector<16x1xf32> to vector<16x128xf32>
    %15 = arith.addf %13, %14 : vector<16x128xf32>
    %cst_5 = arith.constant 0.000000e+00 : f32
    %16 = vector.broadcast %cst_5 : f32 to vector<16x128xf32>
    %17 = arith.maximumf %15, %16 : vector<16x128xf32>
    %18 = vector.broadcast %6 : vector<16x1xf32> to vector<16x128xf32>
    %19 = arith.mulf %17, %18 : vector<16x128xf32>
    %cst_6 = arith.constant dense<0.000000e+00> : vector<128xf32>
    %20 = vector.multi_reduction <add>, %19, %cst_6 [0] : vector<16x128xf32> to vector<128xf32>
    %21 = vector.shape_cast %20 : vector<128xf32> to vector<1x128xf32>
    %22 = vector.broadcast %7 : vector<1x1xf32> to vector<1x128xf32>
    %23 = arith.addf %21, %22 : vector<1x128xf32>
    %cst_7 = arith.constant 5.000000e-01 : f32
    %24 = vector.broadcast %cst_7 : f32 to vector<1x128xf32>
    %25 = arith.mulf %24, %23 : vector<1x128xf32>
    %26 = math.tanh %25 : vector<1x128xf32>
    %cst_8 = arith.constant 1.000000e+00 : f32
    %27 = vector.broadcast %cst_8 : f32 to vector<1x128xf32>
    %28 = arith.addf %27, %26 : vector<1x128xf32>
    %cst_9 = arith.constant 5.000000e-01 : f32
    %29 = vector.broadcast %cst_9 : f32 to vector<1x128xf32>
    %30 = arith.mulf %29, %28 : vector<1x128xf32>
    %c0_10 = arith.constant 0 : index
    %c0_11 = arith.constant 0 : index
    %31 = vector.load %arg3[%c0_10, %c0_11] : memref<1x128xf32, #tpu.memory_space<vmem>>, vector<1x128xf32>
    tpu.vector_store %arg3[%c0_10, %c0_11], %30 {strides = array<i32>} : memref<1x128xf32, #tpu.memory_space<vmem>>, vector<1x128xf32>,
    return
  }
  func.func @transform_0(%arg0: i32) -> (i32, i32) {
    %c0_i32 = arith.constant 0 : i32
    %c0_i32_0 = arith.constant 0 : i32
    %c0_i32_1 = arith.constant 0 : i32
    return %c0_i32, %c0_i32_0 : i32, i32
  }
  func.func @transform_1(%arg0: i32) -> (i32, i32) {
    %c0_i32 = arith.constant 0 : i32
    %c0_i32_0 = arith.constant 0 : i32
    return %c0_i32, %arg0 : i32, i32
  }
  func.func @transform_2(%arg0: i32) -> (i32, i32) {
    %c0_i32 = arith.constant 0 : i32
    %c0_i32_0 = arith.constant 0 : i32
    return %c0_i32, %arg0 : i32, i32
  }
}

</mosaic_0001>

<bundles_post_ra>
// kernel: simple_model_forward.1
= control target key start
LH: loop header
LB: loop body
LE: loop exit
PB: predicated region body
PF: predicated region fallthrough
CT: control target
= control target key end

     0   :  { %vm24_vm0 = vcmask 1042432   ;;  %vm21_vm1 = vcmask 23552   ;;  %v255_v0 = vmov 0.0   ;;  %vm256_vm2 = vmmov 0   ;;  %s296_s1 = inlined_call_operand.vmem [shape: f32[3,128], index: 1, kind: input, shape index: {}]   ;;  %s297_s0 = inlined_call_operand.vmem [shape: f32[32,128], index: 0, kind: input, shape index: {}]   ;;  %s298_s2 = inlined_call_operand.vmem [shape: f32[1,128], index: 2, kind: output, shape index: {}]  }
   0x1   :  { %232 = vmatprep.subr.mxu0 %v255_v0  ;;  %v15_v1 = vld [vmem:[%s296_s1] sm:$0x7]  ;;  %234 = vmatprep.mubr.msk.f32.mxu0 %vm256_vm2, %v255_v0  ;;  %v257_v3 = vmov 3   ;;  %v12_v4 = vld [vmem:[%s297_s0 + $0x8] sm:$0xff]  ;;  %vm109_vm3 = vcmask 64512   ;;  %v13_v5 = vld [vmem:[%s297_s0 + $0x10] sm:$0xff] }
   0x2   :  { %v11_v2 = vld [vmem:[%s297_s0] sm:$0xff]  ;;  %233 = vmatpush3.msk.msra.mxu0 %vm24_vm0, %v15_v1  ;;  %248 = vset.pattern.permute.xlu0 %v257_v3  ;;  %v258_v6 = vmov 8   ;;  %v14_v7 = vld [vmem:[%s297_s0 + $0x18] sm:$0xff]  ;;  %v259_v8 = vmov 9   ;;  %v260_v9 = vmov 0  }
   0x3   :  { %235 = vmatmul.mubr.msk.f32.vlgmr.msra.gmra.mrb[0].mxu0 %vm21_vm1, %v11_v2  ;;  %18 = vperm.xlu0 %248, %v11_v2  }
   0x4   :  { %239 = vmatprep.mubr.msk.f32.mxu1 %vm109_vm3, %v12_v4  ;;  %250 = vset.pattern.permute.xlu1 %v258_v6 }
   0x5   :  { %106 = vperm.xlu1 %250, %v13_v5  }
   0x7   :  { %249 = vset.pattern.permute.xlu0 %v258_v6 }
   0x8   :  { %101 = vperm.xlu0 %249, %v12_v4  }
   0x9   :  { %251 = vset.pattern.permute.xlu1 %v259_v8 }
   0xa   :  { %192 = vperm.xlu1 %251, %v12_v4  }
   0xc   :  { %252 = vset.pattern.permute.xlu0 %v260_v9 }
   0xd   :  { %210 = vperm.xlu0 %252, %v14_v7  }
   0xe   :  { %196 = vperm.xlu1 %251, %v13_v5  }
  0x82   :  { %v19_v10 = vpop.permute.xlu0 %18 }
  0x84   :  { %v107_v15 = vpop.permute.xlu1 %106 }
  0x87   :  { %v102_v17 = vpop.permute.xlu0 %101 }
  0x89   :  { %v193_v16 = vpop.permute.xlu1 %192 }
  0x8c   :  { %v211_v33 = vpop.permute.xlu0 %210 }
  0x8d   :  { %v197_v23 = vpop.permute.xlu1 %196 }
  0xd6   :  { %v94_v11 = vpop.f32.mrb[0].mxu0 }
  0xd7   :  { %v95_v12 = vadd.f32 %v94_v11, %v19_v10  ;;  %v236_v13 = vpop.f32.mrb[1].mxu0 }
  0xd9   :  { %v98_v14 = vmax.f32 %v95_v12, 0.0 }
  0xdb   :  { %237 = vmatprep.subr.mxu1 %v98_v14 }
  0xdc   :  { %238 = vmatpush3.msra.mxu1 %v98_v14 }
  0xdd   :  { %240 = vmatmul.mubr.msk.f32.vlgmr.msra.gmra.mrb[0].mxu1 %vm109_vm3, %v13_v5 }
 0x1b0   :  { %v241_v18 = vpop.f32.mrb[0].mxu1 }
 0x1b1   :  { %v186_v19 = vadd.f32 %v241_v18, %v107_v15  ;;  %v180_v20 = vpop.f32.mrb[1].mxu1 }
 0x1b2   :  { %v181_v21 = vadd.f32 %v180_v20, %v102_v17 }
 0x1b3   :  { %v190_v22 = vmax.f32 %v186_v19, 0.0 }
 0x1b4   :  { %v189_v24 = vmax.f32 %v181_v21, 0.0 }
 0x1b5   :  { %v200_v25 = vmul.f32 %v197_v23, %v190_v22 }
 0x1b6   :  { %v199_v26 = vmul.f32 %v193_v16, %v189_v24 }
 0x1b8   :  { %v201_v27 = vadd.f32 %v200_v25, %v199_v26 }
 0x1ba   :  { %v202_v28 = vrot.slane %v201_v27, 4 }
 0x1bc   :  { %v203_v29 = vadd.f32 %v202_v28, %v201_v27 }
 0x1be   :  { %v204_v30 = vrot.slane %v203_v29, 2 }
 0x1c0   :  { %v205_v31 = vadd.f32 %v204_v30, %v203_v29 }
 0x1c2   :  { %v206_v32 = vrot.slane %v205_v31, 1 }
 0x1c4   :  { %v207_v34 = vadd.f32 %v206_v32, %v205_v31 }
 0x1c6   :  { %v213_v35 = vadd.f32 %v211_v33, %v207_v34 }
 0x1c8   :  { %v214_v36 = vmul.f32 0.5, %v213_v35 }
 0x1ca   :  { %253 = vtanh.f32 %v214_v36 }
 0x1d4   :  { %v254_v37 = vpop.eup %253 }
 0x1d5   :  { %v216_v38 = vadd.f32 1.0, %v254_v37 }
 0x1d7   :  { %v217_v39 = vmul.f32 0.5, %v216_v38 }
 0x1d9   :  { %218 = vst [vmem:[%s298_s2] sm:$0x1] %v217_v39 }

</bundles_post_ra>
